<compile_context>
chip_gen: v6e
topology: v6e:2x2x1
jax: 0.10.0
libtpu: 0.0.40
codegen_flags: <defaults>
</compile_context>

<pallas_src>
import jax
import jax.numpy as jnp
from jax import lax
from jax.experimental import pallas as pl
from jax.experimental.pallas import tpu as pltpu

_EPS = 1e-5
_SENTINEL = 1e18  # finite pad value: squared distance ~3e36 << f32 max (~3.4e38)


def _round_up(x, m):
    return ((x + m - 1) // m) * m


def _arcosh_1p_sqrt(dist):
    """Matches HyperCDL1: arcosh(1 + sqrt(dist)) with clamp(min=1+eps)."""
    x = 1.0 + jnp.sqrt(dist)
    x = jnp.maximum(x, 1.0 + _EPS)
    return jnp.log(x + jnp.sqrt(1.0 + x) * jnp.sqrt(x - 1.0))


def _make_kernel(*, tn, tm, n_valid, m_valid):
    groups = tm // 128  # tm is always a multiple of 128

    def kernel(x1_ref, x2_ref, sum1_ref, sum2_ref, min1_ref, min2_ref):
        # x1_ref: (1, tn, 3)      xyz1 tile (points on sublanes)
        # x2_ref: (1, 3, tm)      xyz2 tile, lane-dense (points on lanes)
        # sum*_ref: (1, 1, 1)     per-batch accumulators (resident across n, m)
        # min1_ref: (tn, 128)     dist1 running min across M tiles (lane-group folded)
        # min2_ref: (1, m_pad)    dist2 running per-column min across N tiles
        n = pl.program_id(1)
        m = pl.program_id(2)
        last_n = pl.num_programs(1) - 1
        last_m = pl.num_programs(2) - 1

        @pl.when((n == 0) & (m == 0))
        def _init():
            sum1_ref[...] = jnp.zeros_like(sum1_ref)
            sum2_ref[...] = jnp.zeros_like(sum2_ref)

        x1 = x1_ref[0]            # (tn, 3)  f32
        x2 = x2_ref[0]            # (3, tm)  f32

        # Hoisted lane-broadcasts of the xyz1 coordinates (reused by every
        # lane group; JAX does not CSE broadcast_in_dim).
        x1b0 = jnp.broadcast_to(x1[:, 0:1], (tn, 128))
        x1b1 = jnp.broadcast_to(x1[:, 1:2], (tn, 128))
        x1b2 = jnp.broadcast_to(x1[:, 2:3], (tn, 128))

        # Exact direct-difference squared distances, processed one 128-lane
        # group of xyz2 at a time (pure VPU, no transpose, no MXU cancellation,
        # no (tn, tm) temporaries).
        m1 = None
        cmins = []
        for g in range(groups):
            x2g = x2[:, g * 128:(g + 1) * 128]            # (3, 128) static slice
            d0 = x1b0 - x2g[0:1, :]
            d1 = x1b1 - x2g[1:2, :]
            d2 = x1b2 - x2g[2:3, :]
            d = d0 * d0 + d1 * d1 + d2 * d2               # (tn, 128)
            m1 = d if m1 is None else jnp.minimum(m1, d)  # lane-group min tree
            cmins.append(jnp.min(d, axis=0, keepdims=True))   # (1, 128) sublane reduce
        colmin = cmins[0] if groups == 1 else jnp.concatenate(cmins, axis=1)  # (1, tm)

        # ---- dist1: running (tn, 128) min across M tiles (small scratch) ---
        @pl.when(m == 0)
        def _():
            min1_ref[...] = m1

        @pl.when(m != 0)
        def _():
            min1_ref[...] = jnp.minimum(min1_ref[...], m1)

        # ---- dist2: running per-column min across N tiles, lane-dense ------
        off = pl.multiple_of(m * tm, 128)

        @pl.when(n == 0)
        def _():
            min2_ref[:, pl.ds(off, tm)] = colmin

        @pl.when(n != 0)
        def _():
            min2_ref[:, pl.ds(off, tm)] = jnp.minimum(
                min2_ref[:, pl.ds(off, tm)], colmin)

        # ---- finalize dist1 for this N tile: one lane reduce + arcosh ------
        @pl.when(m == last_m)
        def _():
            rowmin = jnp.min(min1_ref[...], axis=1, keepdims=True)   # (tn, 1)
            dd1 = _arcosh_1p_sqrt(rowmin)
            row_valid = (n * tn + lax.broadcasted_iota(jnp.int32, (tn, 1), 0)) < n_valid
            dd1 = jnp.where(row_valid, dd1, 0.0)
            sum1_ref[0] = sum1_ref[0] + jnp.sum(dd1, axis=0, keepdims=True)

        # ---- finalize dist2 for this M tile after the last N tile ----------
        @pl.when(n == last_n)
        def _():
            cm = min2_ref[:, pl.ds(off, tm)]                          # (1, tm)
            dd2 = _arcosh_1p_sqrt(cm)
            col_valid = (m * tm + lax.broadcasted_iota(jnp.int32, (1, tm), 1)) < m_valid
            dd2 = jnp.where(col_valid, dd2, 0.0)
            sum2_ref[0] = sum2_ref[0] + jnp.sum(dd2, axis=1, keepdims=True)

    return kernel


def hyper_cdl1(xyz1, xyz2, *, tn_max=512, tm_max=2048):
    """Forward pass of HyperCDL1 (ignore_zeros=False path)."""
    B, N, D = xyz1.shape
    B2, M, D2 = xyz2.shape
    assert B == B2 and D == 3 and D2 == 3

    # Tile sizes: point axes must be (8, 128) friendly.
    tn = min(_round_up(tn_max, 8), _round_up(N, 8))
    tm = min(_round_up(tm_max, 128), _round_up(M, 128))
    n_pad = _round_up(N, tn)
    m_pad = _round_up(M, tm)
    n_tiles = n_pad // tn
    m_tiles = m_pad // tm

    x1 = xyz1.astype(jnp.float32)                                  # (B, N, 3)
    x2t = jnp.transpose(xyz2.astype(jnp.float32), (0, 2, 1))       # (B, 3, M) lane-dense
    # Sentinel padding: padded points are astronomically far from every valid
    # point, so they lose all mins without any per-element masking in-kernel.
    if n_pad != N:
        x1 = jnp.pad(x1, ((0, 0), (0, n_pad - N), (0, 0)),
                     constant_values=_SENTINEL)
    if m_pad != M:
        x2t = jnp.pad(x2t, ((0, 0), (0, 0), (0, m_pad - M)),
                      constant_values=_SENTINEL)

    kernel = _make_kernel(tn=tn, tm=tm, n_valid=N, m_valid=M)

    sum1, sum2 = pl.pallas_call(
        kernel,
        out_shape=(
            jax.ShapeDtypeStruct((B, 1, 1), jnp.float32),
            jax.ShapeDtypeStruct((B, 1, 1), jnp.float32),
        ),
        grid=(B, n_tiles, m_tiles),
        in_specs=[
            pl.BlockSpec((1, tn, 3), lambda b, n, m: (b, n, 0)),
            pl.BlockSpec((1, 3, tm), lambda b, n, m: (b, 0, m)),
        ],
        out_specs=(
            pl.BlockSpec((1, 1, 1), lambda b, n, m: (b, 0, 0)),
            pl.BlockSpec((1, 1, 1), lambda b, n, m: (b, 0, 0)),
        ),
        scratch_shapes=[
            pltpu.VMEM((tn, 128), jnp.float32),     # dist1 running min (tm-independent)
            pltpu.VMEM((1, m_pad), jnp.float32),    # dist2 running min, lane-dense
        ],
        compiler_params=pltpu.CompilerParams(
            dimension_semantics=("parallel", "arbitrary", "arbitrary"),
            vmem_limit_bytes=32 * 1024 * 1024),     # safe on v5e/v6e/v7x; plenty of headroom
    )(x1, x2t)

    # Trivial final combine in JAX: means over the true (unpadded) point counts.
    mean1 = jnp.sum(sum1) / (B * N)
    mean2 = jnp.sum(sum2) / (B * M)
    return 0.5 * (mean1 + mean2)


def _reference(xyz1, xyz2):
    # Pure-JAX reference (direct form), for sanity checking.
    diff = xyz1[:, :, None, :] - xyz2[:, None, :, :]        # (B, N, M, 3)
    d = jnp.sum(diff * diff, axis=-1)                       # (B, N, M)
    dist1 = jnp.min(d, axis=2)
    dist2 = jnp.min(d, axis=1)
    dd1 = _arcosh_1p_sqrt(dist1)
    dd2 = _arcosh_1p_sqrt(dist2)
    return (jnp.mean(dd1) + jnp.mean(dd2)) * 0.5


if __name__ == "__main__":
    key = jax.random.PRNGKey(0)
    k1, k2, k3, k4 = jax.random.split(key, 4)

    # Test 1: small tiles, non-multiple N/M -> exercises multi-tile accumulation
    # along both axes plus sentinel-padded rows/columns and dynamic min2 slicing.
    B, N, M = 2, 200, 300
    xyz1 = jax.random.normal(k1, (B, N, 3), dtype=jnp.float32)
    xyz2 = jax.random.normal(k2, (B, M, 3), dtype=jnp.float32)
    fn_small = jax.jit(lambda a, b: hyper_cdl1(a, b, tn_max=64, tm_max=128))
    out1 = fn_small(xyz1, xyz2)
    jax.block_until_ready(out1)
    ref1 = _reference(xyz1, xyz2)
    assert jnp.allclose(out1, ref1, rtol=1e-4, atol=1e-5), (out1, ref1)

    # Test 2: default (large) tile sizes -> single tile per axis, multi-group loop.
    B, N, M = 2, 512, 640
    xyz1 = jax.random.normal(k3, (B, N, 3), dtype=jnp.float32)
    xyz2 = jax.random.normal(k4, (B, M, 3), dtype=jnp.float32)
    fn_default = jax.jit(hyper_cdl1)
    out2 = fn_default(xyz1, xyz2)
    jax.block_until_ready(out2)
    ref2 = _reference(xyz1, xyz2)
    assert jnp.allclose(out2, ref2, rtol=1e-4, atol=1e-5), (out2, ref2)

    print("KERNEL_OK")
</pallas_src>

<mosaic_0001>
module attributes {stable_mosaic.version = 11 : i64} {
  func.func @kernel(%arg0: i32, %arg1: i32, %arg2: i32, %arg3: memref<1x64x3xf32, #tpu.memory_space<vmem>>, %arg4: memref<1x3x128xf32, #tpu.memory_space<vmem>>, %arg5: memref<1x1x1xf32, #tpu.memory_space<vmem>>, %arg6: memref<1x1x1xf32, #tpu.memory_space<vmem>>, %arg7: memref<64x128xf32, #tpu.memory_space<vmem>>, %arg8: memref<1x384xf32, #tpu.memory_space<vmem>>) attributes {dimension_semantics = [#tpu.dimension_semantics<parallel>, #tpu.dimension_semantics<arbitrary>, #tpu.dimension_semantics<arbitrary>], iteration_bounds = array<i64: 2, 4, 3>, scalar_prefetch = 0 : i64, scratch_operands = 2 : i64, tpu.core_type = #tpu.core_type<tc>, window_params = [{transform_indices = @transform_0, window_bounds = array<i64: 1, 64, 3>}, {transform_indices = @transform_1, window_bounds = array<i64: 1, 3, 128>}, {transform_indices = @transform_2, window_bounds = array<i64: 1, 1, 1>}, {transform_indices = @transform_3, window_bounds = array<i64: 1, 1, 1>}]} {
    %c0_i32 = arith.constant 0 : i32
    %0 = arith.cmpi eq, %arg1, %c0_i32 : i32
    %c0_i32_0 = arith.constant 0 : i32
    %1 = arith.cmpi eq, %arg2, %c0_i32_0 : i32
    %2 = arith.andi %0, %1 : i1
    %3 = arith.extui %2 : i1 to i32
    %c0_i32_1 = arith.constant 0 : i32
    %4 = arith.cmpi ne, %3, %c0_i32_1 : i32
    scf.if %4 {
      %cst_17 = arith.constant 0.000000e+00 : f32
      %54 = vector.broadcast %cst_17 : f32 to vector<1x1x1xf32>
      %c0_18 = arith.constant 0 : index
      %c0_19 = arith.constant 0 : index
      %c0_20 = arith.constant 0 : index
      %55 = vector.load %arg5[%c0_18, %c0_19, %c0_20] : memref<1x1x1xf32, #tpu.memory_space<vmem>>, vector<1x1x1xf32>
      tpu.vector_store %arg5[%c0_18, %c0_19, %c0_20], %54 {strides = array<i32>} : memref<1x1x1xf32, #tpu.memory_space<vmem>>, vector<1x1x1xf32>,
      %cst_21 = arith.constant 0.000000e+00 : f32
      %56 = vector.broadcast %cst_21 : f32 to vector<1x1x1xf32>
      %c0_22 = arith.constant 0 : index
      %c0_23 = arith.constant 0 : index
      %c0_24 = arith.constant 0 : index
      %57 = vector.load %arg6[%c0_22, %c0_23, %c0_24] : memref<1x1x1xf32, #tpu.memory_space<vmem>>, vector<1x1x1xf32>
      tpu.vector_store %arg6[%c0_22, %c0_23, %c0_24], %56 {strides = array<i32>} : memref<1x1x1xf32, #tpu.memory_space<vmem>>, vector<1x1x1xf32>,
    } else {
    }
    %c0 = arith.constant 0 : index
    %c0_2 = arith.constant 0 : index
    %c0_3 = arith.constant 0 : index
    %5 = vector.load %arg3[%c0, %c0_2, %c0_3] : memref<1x64x3xf32, #tpu.memory_space<vmem>>, vector<1x64x3xf32>
    %6 = vector.shape_cast %5 : vector<1x64x3xf32> to vector<64x3xf32>
    %c0_4 = arith.constant 0 : index
    %c0_5 = arith.constant 0 : index
    %c0_6 = arith.constant 0 : index
    %7 = vector.load %arg4[%c0_4, %c0_5, %c0_6] : memref<1x3x128xf32, #tpu.memory_space<vmem>>, vector<1x3x128xf32>
    %8 = vector.shape_cast %7 : vector<1x3x128xf32> to vector<3x128xf32>
    %9 = vector.extract_strided_slice %6 {offsets = [0, 0], sizes = [64, 1], strides = [1, 1]} : vector<64x3xf32> to vector<64x1xf32>
    %10 = vector.shape_cast %9 : vector<64x1xf32> to vector<64x1xf32>
    %11 = vector.broadcast %10 : vector<64x1xf32> to vector<64x128xf32>
    %12 = vector.extract_strided_slice %6 {offsets = [0, 1], sizes = [64, 1], strides = [1, 1]} : vector<64x3xf32> to vector<64x1xf32>
    %13 = vector.shape_cast %12 : vector<64x1xf32> to vector<64x1xf32>
    %14 = vector.broadcast %13 : vector<64x1xf32> to vector<64x128xf32>
    %15 = vector.extract_strided_slice %6 {offsets = [0, 2], sizes = [64, 1], strides = [1, 1]} : vector<64x3xf32> to vector<64x1xf32>
    %16 = vector.shape_cast %15 : vector<64x1xf32> to vector<64x1xf32>
    %17 = vector.broadcast %16 : vector<64x1xf32> to vector<64x128xf32>
    %18 = vector.extract_strided_slice %8 {offsets = [0, 0], sizes = [1, 128], strides = [1, 1]} : vector<3x128xf32> to vector<1x128xf32>
    %19 = vector.broadcast %18 : vector<1x128xf32> to vector<64x128xf32>
    %20 = arith.subf %11, %19 : vector<64x128xf32>
    %21 = vector.extract_strided_slice %8 {offsets = [1, 0], sizes = [1, 128], strides = [1, 1]} : vector<3x128xf32> to vector<1x128xf32>
    %22 = vector.broadcast %21 : vector<1x128xf32> to vector<64x128xf32>
    %23 = arith.subf %14, %22 : vector<64x128xf32>
    %24 = vector.extract_strided_slice %8 {offsets = [2, 0], sizes = [1, 128], strides = [1, 1]} : vector<3x128xf32> to vector<1x128xf32>
    %25 = vector.broadcast %24 : vector<1x128xf32> to vector<64x128xf32>
    %26 = arith.subf %17, %25 : vector<64x128xf32>
    %27 = arith.mulf %20, %20 : vector<64x128xf32>
    %28 = arith.mulf %23, %23 : vector<64x128xf32>
    %29 = arith.addf %27, %28 : vector<64x128xf32>
    %30 = arith.mulf %26, %26 : vector<64x128xf32>
    %31 = arith.addf %29, %30 : vector<64x128xf32>
    %cst = arith.constant dense<0x7F800000> : vector<128xf32>
    %32 = vector.multi_reduction <minimumf>, %31, %cst [0] : vector<64x128xf32> to vector<128xf32>
    %33 = vector.shape_cast %32 : vector<128xf32> to vector<1x128xf32>
    %c0_i32_7 = arith.constant 0 : i32
    %34 = arith.cmpi eq, %arg2, %c0_i32_7 : i32
    %35 = arith.extui %34 : i1 to i32
    %c0_i32_8 = arith.constant 0 : i32
    %36 = arith.cmpi ne, %35, %c0_i32_8 : i32
    scf.if %36 {
      %c0_17 = arith.constant 0 : index
      %c0_18 = arith.constant 0 : index
      %54 = vector.load %arg7[%c0_17, %c0_18] : memref<64x128xf32, #tpu.memory_space<vmem>>, vector<64x128xf32>
      tpu.vector_store %arg7[%c0_17, %c0_18], %31 {strides = array<i32>} : memref<64x128xf32, #tpu.memory_space<vmem>>, vector<64x128xf32>,
    } else {
    }
    %c0_i32_9 = arith.constant 0 : i32
    %37 = arith.cmpi ne, %arg2, %c0_i32_9 : i32
    %38 = arith.extui %37 : i1 to i32
    %c0_i32_10 = arith.constant 0 : i32
    %39 = arith.cmpi ne, %38, %c0_i32_10 : i32
    scf.if %39 {
      %c0_17 = arith.constant 0 : index
      %c0_18 = arith.constant 0 : index
      %54 = vector.load %arg7[%c0_17, %c0_18] : memref<64x128xf32, #tpu.memory_space<vmem>>, vector<64x128xf32>
      %55 = arith.minimumf %54, %31 : vector<64x128xf32>
      %c0_19 = arith.constant 0 : index
      %c0_20 = arith.constant 0 : index
      %56 = vector.load %arg7[%c0_19, %c0_20] : memref<64x128xf32, #tpu.memory_space<vmem>>, vector<64x128xf32>
      tpu.vector_store %arg7[%c0_19, %c0_20], %55 {strides = array<i32>} : memref<64x128xf32, #tpu.memory_space<vmem>>, vector<64x128xf32>,
    } else {
    }
    %c128_i32 = arith.constant 128 : i32
    %40 = arith.muli %arg2, %c128_i32 : i32
    %41 = tpu.assume_multiple %40, 128 : i32
    %c0_i32_11 = arith.constant 0 : i32
    %42 = arith.cmpi eq, %arg1, %c0_i32_11 : i32
    %43 = arith.extui %42 : i1 to i32
    %c0_i32_12 = arith.constant 0 : i32
    %44 = arith.cmpi ne, %43, %c0_i32_12 : i32
    scf.if %44 {
      %c0_17 = arith.constant 0 : index
      %54 = arith.index_cast %41 : i32 to index
      %55 = vector.load %arg8[%c0_17, %54] : memref<1x384xf32, #tpu.memory_space<vmem>>, vector<1x128xf32>
      tpu.vector_store %arg8[%c0_17, %54], %33 {strides = array<i32>} : memref<1x384xf32, #tpu.memory_space<vmem>>, vector<1x128xf32>,
    } else {
    }
    %c0_i32_13 = arith.constant 0 : i32
    %45 = arith.cmpi ne, %arg1, %c0_i32_13 : i32
    %46 = arith.extui %45 : i1 to i32
    %c0_i32_14 = arith.constant 0 : i32
    %47 = arith.cmpi ne, %46, %c0_i32_14 : i32
    scf.if %47 {
      %c0_17 = arith.constant 0 : index
      %54 = arith.index_cast %41 : i32 to index
      %55 = vector.load %arg8[%c0_17, %54] : memref<1x384xf32, #tpu.memory_space<vmem>>, vector<1x128xf32>
      %56 = arith.minimumf %55, %33 : vector<1x128xf32>
      %c0_18 = arith.constant 0 : index
      %57 = arith.index_cast %41 : i32 to index
      %58 = vector.load %arg8[%c0_18, %57] : memref<1x384xf32, #tpu.memory_space<vmem>>, vector<1x128xf32>
      tpu.vector_store %arg8[%c0_18, %57], %56 {strides = array<i32>} : memref<1x384xf32, #tpu.memory_space<vmem>>, vector<1x128xf32>,
    } else {
    }
    %c2_i32 = arith.constant 2 : i32
    %48 = arith.cmpi eq, %arg2, %c2_i32 : i32
    %49 = arith.extui %48 : i1 to i32
    %c0_i32_15 = arith.constant 0 : i32
    %50 = arith.cmpi ne, %49, %c0_i32_15 : i32
    scf.if %50 {
      %c0_17 = arith.constant 0 : index
      %c0_18 = arith.constant 0 : index
      %54 = vector.load %arg7[%c0_17, %c0_18] : memref<64x128xf32, #tpu.memory_space<vmem>>, vector<64x128xf32>
      %cst_19 = arith.constant dense<0x7F800000> : vector<64xf32>
      %55 = vector.multi_reduction <minimumf>, %54, %cst_19 [1] : vector<64x128xf32> to vector<64xf32>
      %56 = vector.shape_cast %55 : vector<64xf32> to vector<64x1xf32>
      %57 = math.sqrt %56 : vector<64x1xf32>
      %cst_20 = arith.constant 1.000000e+00 : f32
      %58 = vector.broadcast %cst_20 : f32 to vector<64x1xf32>
      %59 = arith.addf %58, %57 : vector<64x1xf32>
      %cst_21 = arith.constant 1.000010e+00 : f32
      %60 = vector.broadcast %cst_21 : f32 to vector<64x1xf32>
      %61 = arith.maximumf %59, %60 : vector<64x1xf32>
      %cst_22 = arith.constant 1.000000e+00 : f32
      %62 = vector.broadcast %cst_22 : f32 to vector<64x1xf32>
      %63 = arith.addf %62, %61 : vector<64x1xf32>
      %64 = math.sqrt %63 : vector<64x1xf32>
      %cst_23 = arith.constant 1.000000e+00 : f32
      %65 = vector.broadcast %cst_23 : f32 to vector<64x1xf32>
      %66 = arith.subf %61, %65 : vector<64x1xf32>
      %67 = math.sqrt %66 : vector<64x1xf32>
      %68 = arith.mulf %64, %67 : vector<64x1xf32>
      %69 = arith.addf %61, %68 : vector<64x1xf32>
      %70 = math.log %69 : vector<64x1xf32>
      %c64_i32 = arith.constant 64 : i32
      %71 = arith.muli %arg1, %c64_i32 : i32
      %72 = tpu.iota {dimensions = array<i32: 0>} : vector<64x1xi32>
      %73 = vector.broadcast %71 : i32 to vector<64x1xi32>
      %74 = arith.addi %73, %72 : vector<64x1xi32>
      %c200_i32 = arith.constant 200 : i32
      %75 = vector.broadcast %c200_i32 : i32 to vector<64x1xi32>
      %76 = arith.cmpi slt, %74, %75 : vector<64x1xi32>
      %cst_24 = arith.constant 0.000000e+00 : f32
      %77 = vector.broadcast %cst_24 : f32 to vector<64x1xf32>
      %78 = arith.select %76, %70, %77 : vector<64x1xi1>, vector<64x1xf32>
      %c0_25 = arith.constant 0 : index
      %c0_26 = arith.constant 0 : index
      %c0_27 = arith.constant 0 : index
      %79 = vector.load %arg5[%c0_25, %c0_26, %c0_27] : memref<1x1x1xf32, #tpu.memory_space<vmem>>, vector<1x1x1xf32>
      %80 = vector.shape_cast %79 : vector<1x1x1xf32> to vector<1x1xf32>
      %cst_28 = arith.constant dense<0.000000e+00> : vector<1xf32>
      %81 = vector.multi_reduction <add>, %78, %cst_28 [0] : vector<64x1xf32> to vector<1xf32>
      %82 = vector.shape_cast %81 : vector<1xf32> to vector<1x1xf32>
      %83 = arith.addf %80, %82 : vector<1x1xf32>
      %c0_29 = arith.constant 0 : index
      %c0_30 = arith.constant 0 : index
      %c0_31 = arith.constant 0 : index
      %84 = vector.load %arg5[%c0_29, %c0_30, %c0_31] : memref<1x1x1xf32, #tpu.memory_space<vmem>>, vector<1x1x1xf32>
      %85 = vector.shape_cast %84 : vector<1x1x1xf32> to vector<1x1xf32>
      %86 = vector.shape_cast %83 : vector<1x1xf32> to vector<1x1x1xf32>
      tpu.vector_store %arg5[%c0_29, %c0_30, %c0_31], %86 {strides = array<i32>} : memref<1x1x1xf32, #tpu.memory_space<vmem>>, vector<1x1x1xf32>,
    } else {
    }
    %c3_i32 = arith.constant 3 : i32
    %51 = arith.cmpi eq, %arg1, %c3_i32 : i32
    %52 = arith.extui %51 : i1 to i32
    %c0_i32_16 = arith.constant 0 : i32
    %53 = arith.cmpi ne, %52, %c0_i32_16 : i32
    scf.if %53 {
      %c0_17 = arith.constant 0 : index
      %54 = arith.index_cast %41 : i32 to index
      %55 = vector.load %arg8[%c0_17, %54] : memref<1x384xf32, #tpu.memory_space<vmem>>, vector<1x128xf32>
      %56 = math.sqrt %55 : vector<1x128xf32>
      %cst_18 = arith.constant 1.000000e+00 : f32
      %57 = vector.broadcast %cst_18 : f32 to vector<1x128xf32>
      %58 = arith.addf %57, %56 : vector<1x128xf32>
      %cst_19 = arith.constant 1.000010e+00 : f32
      %59 = vector.broadcast %cst_19 : f32 to vector<1x128xf32>
      %60 = arith.maximumf %58, %59 : vector<1x128xf32>
      %cst_20 = arith.constant 1.000000e+00 : f32
      %61 = vector.broadcast %cst_20 : f32 to vector<1x128xf32>
      %62 = arith.addf %61, %60 : vector<1x128xf32>
      %63 = math.sqrt %62 : vector<1x128xf32>
      %cst_21 = arith.constant 1.000000e+00 : f32
      %64 = vector.broadcast %cst_21 : f32 to vector<1x128xf32>
      %65 = arith.subf %60, %64 : vector<1x128xf32>
      %66 = math.sqrt %65 : vector<1x128xf32>
      %67 = arith.mulf %63, %66 : vector<1x128xf32>
      %68 = arith.addf %60, %67 : vector<1x128xf32>
      %69 = math.log %68 : vector<1x128xf32>
      %c128_i32_22 = arith.constant 128 : i32
      %70 = arith.muli %arg2, %c128_i32_22 : i32
      %71 = tpu.iota {dimensions = array<i32: 1>} : vector<1x128xi32>
      %72 = vector.broadcast %70 : i32 to vector<1x128xi32>
      %73 = arith.addi %72, %71 : vector<1x128xi32>
      %c300_i32 = arith.constant 300 : i32
      %74 = vector.broadcast %c300_i32 : i32 to vector<1x128xi32>
      %75 = arith.cmpi slt, %73, %74 : vector<1x128xi32>
      %cst_23 = arith.constant 0.000000e+00 : f32
      %76 = vector.broadcast %cst_23 : f32 to vector<1x128xf32>
      %77 = arith.select %75, %69, %76 : vector<1x128xi1>, vector<1x128xf32>
      %c0_24 = arith.constant 0 : index
      %c0_25 = arith.constant 0 : index
      %c0_26 = arith.constant 0 : index
      %78 = vector.load %arg6[%c0_24, %c0_25, %c0_26] : memref<1x1x1xf32, #tpu.memory_space<vmem>>, vector<1x1x1xf32>
      %79 = vector.shape_cast %78 : vector<1x1x1xf32> to vector<1x1xf32>
      %cst_27 = arith.constant dense<0.000000e+00> : vector<1xf32>
      %80 = vector.multi_reduction <add>, %77, %cst_27 [1] : vector<1x128xf32> to vector<1xf32>
      %81 = vector.shape_cast %80 : vector<1xf32> to vector<1x1xf32>
      %82 = arith.addf %79, %81 : vector<1x1xf32>
      %c0_28 = arith.constant 0 : index
      %c0_29 = arith.constant 0 : index
      %c0_30 = arith.constant 0 : index
      %83 = vector.load %arg6[%c0_28, %c0_29, %c0_30] : memref<1x1x1xf32, #tpu.memory_space<vmem>>, vector<1x1x1xf32>
      %84 = vector.shape_cast %83 : vector<1x1x1xf32> to vector<1x1xf32>
      %85 = vector.shape_cast %82 : vector<1x1xf32> to vector<1x1x1xf32>
      tpu.vector_store %arg6[%c0_28, %c0_29, %c0_30], %85 {strides = array<i32>} : memref<1x1x1xf32, #tpu.memory_space<vmem>>, vector<1x1x1xf32>,
    } else {
    }
    return
  }
  func.func @transform_0(%arg0: i32, %arg1: i32, %arg2: i32) -> (i32, i32, i32) {
    %c0_i32 = arith.constant 0 : i32
    %c0_i32_0 = arith.constant 0 : i32
    return %arg0, %arg1, %c0_i32 : i32, i32, i32
  }
  func.func @transform_1(%arg0: i32, %arg1: i32, %arg2: i32) -> (i32, i32, i32) {
    %c0_i32 = arith.constant 0 : i32
    %c0_i32_0 = arith.constant 0 : i32
    return %arg0, %c0_i32, %arg2 : i32, i32, i32
  }
  func.func @transform_2(%arg0: i32, %arg1: i32, %arg2: i32) -> (i32, i32, i32) {
    %c0_i32 = arith.constant 0 : i32
    %c0_i32_0 = arith.constant 0 : i32
    %c0_i32_1 = arith.constant 0 : i32
    return %arg0, %c0_i32, %c0_i32_0 : i32, i32, i32
  }
  func.func @transform_3(%arg0: i32, %arg1: i32, %arg2: i32) -> (i32, i32, i32) {
    %c0_i32 = arith.constant 0 : i32
    %c0_i32_0 = arith.constant 0 : i32
    %c0_i32_1 = arith.constant 0 : i32
    return %arg0, %c0_i32, %c0_i32_0 : i32, i32, i32
  }
}

</mosaic_0001>

<bundles_post_ra>
// kernel: _lambda_.1
= control target key start
LH: loop header
LB: loop body
LE: loop exit
PB: predicated region body
PF: predicated region fallthrough
CT: control target
= control target key end

     0   :  { %s1244_s12 = smov 0   ;;  %s1246_s13 = smov 0   ;;  %s1610_s0 = inlined_call_operand.vmem [shape: f32[2,256,3], index: 0, kind: input, shape index: {}]   ;;  %s1611_s1 = inlined_call_operand.vmem [shape: f32[2,3,384], index: 1, kind: input, shape index: {}]   ;;  %s1612_s2 = inlined_call_operand.vmem [shape: f32[2,1,1], index: 2, kind: output, shape index: {0}]   ;;  %s1613_s3 = inlined_call_operand.vmem [shape: f32[2,1,1], index: 3, kind: output, shape index: {1}]  }
   0x1   :  { %s1248_s14 = smov 0   ;;  %s1250_s15 = smov 0  }
   0x2   :  { %s1252_s16 = smov 0   ;;  %s1254_s17 = smov 0  }
   0x3   :  { %s1256_s18 = smov 0  }
   0x4 LB: > { %s26_s19 = sadd.s32 1, %s1206_s15  ;;  %s29_s20 = sadd.s32 1, %s1210_s16  ;;  %s1218_s18 = sphi %s1256_s18, %s14_s18   ;;  %s1214_s17 = sphi %s1254_s17, %s1619_s17   ;;  %s1210_s16 = sphi %s1252_s16, %s1618_s16   ;;  %s1206_s15 = sphi %s1250_s15, %s1617_s15   ;;  %s1202_s14 = sphi %s1248_s14, %s1616_s14   ;;  %s1198_s13 = sphi %s1246_s13, %s1615_s13   ;;  %s1194_s12 = sphi %s1244_s12, %s1614_s12  }
   0x5   : > { %p27_p0 = scmp.ge.s32.totalorder %s26_s19, 3  ;;  %p1001_p1 = scmp.ge.s32.totalorder %s1218_s18, 1 }
   0x6   : > { %p181_p2 = scmp.lt.s32.totalorder %s1218_s18, 25  ;;  %s33_s21 = sadd.s32 1, %s1214_s17 }
   0x7   : > { %s1621_s19 = smov (%p27_p0, %s26_s19), 0  ;;  %s1623_s20 = smov (!%p27_p0, %s29_s20), %s1210_s16 }
   0x8   : > { %p182_p3 = pnand %p1001_p1, %p181_p2  ;;  %p31_p4 = scmp.ge.s32.totalorder %s1623_s20, 4 }
   0x9   : > { %s1002_s22 = sshll.u32 (!%p182_p3), %s1198_s13, 3  ;;  %p219_p6 = scmp.lt.s32.totalorder (!%p182_p3), %s1202_s14, 1 }
   0xa   : > { %s1625_s20 = smov (%p31_p4, %s1623_s20), 0  ;;  %s1627_s21 = smov (!%p31_p4, %s33_s21), %s1214_s17 }
   0xb   : > { %p35_p5 = scmp.ge.s32.totalorder %s1627_s21, 2  ;;  %185 = sbr.rel (%p182_p3) target bundleno = 736 (0x2e0), region = 28 }
   0xc   : > { %p221_p7 = scmp.lt.s32.totalorder (!%p182_p3), %s1002_s22, 31  ;;  %p230_p8 = scmp.lt.s32.totalorder (!%p182_p3), %s1194_s12, 2 }
   0xd   : > { %s1629_s21 = smov (%p35_p5, %s1627_s21), 0  ;;  %p242_p9 = scmp.eq.s32.totalorder (!%p182_p3), %s1198_s13, 0 }
   0xe   : > { %p243_p10 = scmp.eq.s32.totalorder (!%p182_p3), %s1194_s12, 0 }
  0x10   : > { %s1631_s14 = smov (!%p219_p6, %s1202_s14), 1  ;;  %s1633_s22 = smov (!%p221_p7, %s1002_s22), 31 }
  0x11   : > { %s1003_s23 = sshll.u32 %s1631_s14, 5  ;;  %s1025_s24 = smul.u32 3, %s1631_s14 }
  0x12   : > { %s224_s25 = sadd.s32 %s1003_s23, %s1633_s22  ;;  %s1295_s28 = scalar_lea.vmem %s1612_s2, %s1631_s14 }
  0x13   : > { %s1004_s29 = sshll.u32 %s224_s25, 3  ;;  %s1300_s5 = scalar_lea.vmem %s1613_s3, %s1631_s14 }
  0x14   : > { %s226_s8 = scalar_lea.vmem %s1610_s0, %s1004_s29  ;;  %p244_p11 = pnand %p243_p10, %p242_p9 }
  0x15   : > { %s231_s9 = scalar_select %p230_p8, %s1194_s12, 2 }
  0x16   : > { %247 = sbr.rel (%p244_p11) target bundleno = 29 (0x1d), region = 32 }
  0x17   : > { %s233_s10 = sadd.s32 %s1025_s24, %s231_s9 }
  0x18   : > { %s1005_s11 = sshll.u32 %s233_s10, 2 }
  0x19   : > { %s1315_s25 = scalar_lea.vmem %s1611_s1, %s1005_s11 }
  0x1b   : > { %vm248_vm0 = vcmask 0   ;;  %v1220_v0 = vmov 0.0  }
  0x1c   : > { %249 = vst.msk [vmem:[%s1295_s28] sm:$0x1] %vm248_vm0, %v1220_v0  ;;  %250 = vst.msk [vmem:[%s1300_s5] sm:$0x1] %vm248_vm0, %v1220_v0 }
  0x1d PF: > { %v253_v1 = vld [vmem:[%s226_s8 + $0x10] sm:$0xff]  ;;  %v251_v2 = vld [vmem:[%s226_s8] sm:$0xff]  ;;  %v1221_v3 = vmov 0   ;;  %v254_v4 = vld [vmem:[%s226_s8 + $0x18] sm:$0xff]  ;;  %v1222_v10 = vmov 1   ;;  %v1223_v11 = vmov 2   ;;  %v364_v22 = vlaneseq }
  0x1e   : > { %1087 = vset.pattern.permute.xlu1 %v1221_v3  ;;  %1086 = vset.pattern.permute.xlu0 %v1221_v3  ;;  %v252_v5 = vld [vmem:[%s226_s8 + $0x8] sm:$0xff]  ;;  %v255_v7 = vld [vmem:[%s226_s8 + $0x20] sm:$0xff]  ;;  %v258_v8 = vld [vmem:[%s226_s8 + $0x38] sm:$0xff]  ;;  %p1006_p12 = scmp.ne.s32.totalorder %s1194_s12, 0 }
  0x1f   : > { %272 = vperm.xlu1 %1087, %v253_v1   ;;  %262 = vperm.xlu0 %1086, %v251_v2   ;;  %v256_v6 = vld [vmem:[%s226_s8 + $0x28] sm:$0xff]  ;;  %v257_v9 = vld [vmem:[%s226_s8 + $0x30] sm:$0xff]  ;;  %v1320_v25 = vshrl.u32 %v364_v22, 7  ;;  %v259_v31 = vld [vmem:[%s1315_s25] sm:$0x7] }
  0x21   : > { %v366_v28 = vsub.s32 0, %v1320_v25  ;;  %v378_v33 = vsub.s32 1, %v1320_v25  ;;  %v390_v36 = vsub.s32 2, %v1320_v25 }
  0x23   : > { %277 = vperm.xlu1 %1087, %v254_v4   ;;  %267 = vperm.xlu0 %1086, %v252_v5   ;;  %v367_v32 = vrot.slane %v259_v31, %v366_v28  ;;  %v379_v41 = vrot.slane %v259_v31, %v378_v33  ;;  %v391_v48 = vrot.slane %v259_v31, %v390_v36 }
  0x27   : > { %287 = vperm.xlu1 %1087, %v256_v6   ;;  %282 = vperm.xlu0 %1086, %v255_v7  }
  0x2b   : > { %297 = vperm.xlu1 %1087, %v258_v8   ;;  %292 = vperm.xlu0 %1086, %v257_v9  }
  0x2f   : > { %1089 = vset.pattern.permute.xlu1 %v1222_v10  ;;  %1088 = vset.pattern.permute.xlu0 %v1222_v10 }
  0x30   : > { %305 = vperm.xlu1 %1089, %v252_v5   ;;  %301 = vperm.xlu0 %1088, %v251_v2  }
  0x34   : > { %309 = vperm.xlu1 %1089, %v253_v1   ;;  %313 = vperm.xlu0 %1088, %v254_v4  }
  0x38   : > { %317 = vperm.xlu1 %1089, %v255_v7   ;;  %321 = vperm.xlu0 %1088, %v256_v6  }
  0x3c   : > { %325 = vperm.xlu1 %1089, %v257_v9   ;;  %329 = vperm.xlu0 %1088, %v258_v8  }
  0x40   : > { %1090 = vset.pattern.permute.xlu1 %v1223_v11  ;;  %1091 = vset.pattern.permute.xlu0 %v1223_v11 }
  0x41   : > { %333 = vperm.xlu1 %1090, %v251_v2   ;;  %337 = vperm.xlu0 %1091, %v252_v5  }
  0x45   : > { %341 = vperm.xlu1 %1090, %v253_v1   ;;  %349 = vperm.xlu0 %1091, %v255_v7  }
  0x49   : > { %345 = vperm.xlu1 %1090, %v254_v4   ;;  %357 = vperm.xlu0 %1091, %v257_v9  }
  0x4d   : > { %353 = vperm.xlu1 %1090, %v256_v6  }
  0x51   : > { %361 = vperm.xlu1 %1090, %v258_v8  }
  0x9a   : > { %v273_v12 = vpop.permute.xlu1 %272  ;;  %v263_v13 = vpop.permute.xlu0 %262 }
  0x9b   : > { %v370_v37 = vsub.f32 %v273_v12, %v367_v32  ;;  %v368_v38 = vsub.f32 %v263_v13, %v367_v32 }
  0x9d   : > { %v402_v49 = vmul.f32 %v370_v37, %v370_v37  ;;  %v400_v50 = vmul.f32 %v368_v38, %v368_v38 }
  0x9e   : > { %v278_v14 = vpop.permute.xlu1 %277  ;;  %v268_v15 = vpop.permute.xlu0 %267 }
  0x9f   : > { %v371_v39 = vsub.f32 %v278_v14, %v367_v32  ;;  %v369_v40 = vsub.f32 %v268_v15, %v367_v32 }
  0xa1   : > { %v403_v51 = vmul.f32 %v371_v39, %v371_v39  ;;  %v401_v53 = vmul.f32 %v369_v40, %v369_v40 }
  0xa2   : > { %v288_v16 = vpop.permute.xlu1 %287  ;;  %v283_v17 = vpop.permute.xlu0 %282 }
  0xa3   : > { %v373_v44 = vsub.f32 %v288_v16, %v367_v32  ;;  %v372_v45 = vsub.f32 %v283_v17, %v367_v32 }
  0xa5   : > { %v405_v59 = vmul.f32 %v373_v44, %v373_v44  ;;  %v404_v60 = vmul.f32 %v372_v45, %v372_v45 }
  0xa6   : > { %v298_v18 = vpop.permute.xlu1 %297  ;;  %v293_v19 = vpop.permute.xlu0 %292 }
  0xa7   : > { %v375_v46 = vsub.f32 %v298_v18, %v367_v32  ;;  %v374_v52 = vsub.f32 %v293_v19, %v367_v32 }
  0xa9   : > { %v407_v61 = vmul.f32 %v375_v46, %v375_v46  ;;  %v406_v3 = vmul.f32 %v374_v52, %v374_v52 }
  0xab   : > { %v306_v20 = vpop.permute.xlu1 %305  ;;  %v302_v21 = vpop.permute.xlu0 %301 }
  0xac   : > { %v381_v54 = vsub.f32 %v306_v20, %v379_v41  ;;  %v380_v62 = vsub.f32 %v302_v21, %v379_v41 }
  0xae   : > { %v409_v7 = vmul.f32 %v381_v54, %v381_v54  ;;  %v408_v12 = vmul.f32 %v380_v62, %v380_v62 }
  0xaf   : > { %v310_v23 = vpop.permute.xlu1 %309  ;;  %v314_v24 = vpop.permute.xlu0 %313 }
  0xb0   : > { %v382_v63 = vsub.f32 %v310_v23, %v379_v41  ;;  %v383_v0 = vsub.f32 %v314_v24, %v379_v41 }
  0xb2   : > { %v410_v16 = vmul.f32 %v382_v63, %v382_v63  ;;  %v411_v17 = vmul.f32 %v383_v0, %v383_v0 }
  0xb3   : > { %v318_v26 = vpop.permute.xlu1 %317  ;;  %v322_v27 = vpop.permute.xlu0 %321 }
  0xb4   : > { %v385_v47 = vsub.f32 %v322_v27, %v379_v41  ;;  %v384_v55 = vsub.f32 %v318_v26, %v379_v41  ;;  %v417_v26 = vadd.f32 %v409_v7, %v401_v53  ;;  %v418_v36 = vadd.f32 %v410_v16, %v402_v49 }
  0xb5   : > { %v419_v37 = vadd.f32 %v411_v17, %v403_v51 }
  0xb6   : > { %v413_v1 = vmul.f32 %v385_v47, %v385_v47  ;;  %v412_v8 = vmul.f32 %v384_v55, %v384_v55 }
  0xb7   : > { %v326_v29 = vpop.permute.xlu1 %325  ;;  %v330_v30 = vpop.permute.xlu0 %329 }
  0xb8   : > { %v386_v56 = vsub.f32 %v326_v29, %v379_v41  ;;  %v387_v2 = vsub.f32 %v330_v30, %v379_v41  ;;  %v421_v18 = vadd.f32 %v413_v1, %v405_v59  ;;  %v420_v27 = vadd.f32 %v412_v8, %v404_v60 }
  0xba   : > { %v414_v9 = vmul.f32 %v386_v56, %v386_v56  ;;  %v415_v19 = vmul.f32 %v387_v2, %v387_v2 }
  0xbc   : > { %v334_v34 = vpop.permute.xlu1 %333  ;;  %v338_v35 = vpop.permute.xlu0 %337  ;;  %v422_v28 = vadd.f32 %v414_v9, %v406_v3  ;;  %v423_v38 = vadd.f32 %v415_v19, %v407_v61 }
  0xbd   : > { %v393_v4 = vsub.f32 %v338_v35, %v391_v48  ;;  %v392_v10 = vsub.f32 %v334_v34, %v391_v48  ;;  %v416_v35 = vadd.f32 %v408_v12, %v400_v50 }
  0xbf   : > { %v425_v20 = vmul.f32 %v393_v4, %v393_v4  ;;  %v424_v29 = vmul.f32 %v392_v10, %v392_v10 }
  0xc0   : > { %v342_v42 = vpop.permute.xlu1 %341  ;;  %v350_v43 = vpop.permute.xlu0 %349 }
  0xc1   : > { %v396_v5 = vsub.f32 %v350_v43, %v391_v48  ;;  %v394_v13 = vsub.f32 %v342_v42, %v391_v48  ;;  %v433_v39 = vadd.f32 %v425_v20, %v417_v26  ;;  %v432_v43 = vadd.f32 %v424_v29, %v416_v35 }
  0xc3   : > { %v428_v21 = vmul.f32 %v396_v5, %v396_v5  ;;  %v426_v31 = vmul.f32 %v394_v13, %v394_v13 }
  0xc4   : > { %v346_v57 = vpop.permute.xlu1 %345  ;;  %v358_v58 = vpop.permute.xlu0 %357 }
  0xc5   : > { %v398_v6 = vsub.f32 %v358_v58, %v391_v48  ;;  %v395_v14 = vsub.f32 %v346_v57, %v391_v48  ;;  %v436_v40 = vadd.f32 %v428_v21, %v420_v27  ;;  %v434_v44 = vadd.f32 %v426_v31, %v418_v36 }
  0xc7   : > { %v430_v23 = vmul.f32 %v398_v6, %v398_v6  ;;  %v427_v32 = vmul.f32 %v395_v14, %v395_v14  ;;  %v440_v52 = vmin.f32 %v432_v43, %v436_v40 }
  0xc8   : > { %v354_v11 = vpop.permute.xlu1 %353 }
  0xc9   : > { %v397_v15 = vsub.f32 %v354_v11, %v391_v48  ;;  %v438_v41 = vadd.f32 %v430_v23, %v422_v28  ;;  %v435_v45 = vadd.f32 %v427_v32, %v419_v37 }
  0xcb   : > { %v429_v24 = vmul.f32 %v397_v15, %v397_v15  ;;  %v442_v53 = vmin.f32 %v434_v44, %v438_v41 }
  0xcc   : > { %v362_v30 = vpop.permute.xlu1 %361 }
  0xcd   : > { %v437_v33 = vadd.f32 %v429_v24, %v421_v18  ;;  %v399_v34 = vsub.f32 %v362_v30, %v391_v48 }
  0xcf   : > { %v431_v42 = vmul.f32 %v399_v34, %v399_v34  ;;  %v441_v46 = vmin.f32 %v433_v39, %v437_v33 }
  0xd1   : > { %v439_v47 = vadd.f32 %v431_v42, %v423_v38  ;;  %v444_v55 = vmin.f32 %v440_v52, %v441_v46 }
  0xd3   : > { %v443_v54 = vmin.f32 %v435_v45, %v439_v47 }
  0xd5   : > { %v445_v56 = vmin.f32 %v442_v53, %v443_v54 }
  0xd7   : > { %v446_v57 = vmin.f32 %v444_v55, %v445_v56 }
  0xd9   : > { %v447_v48 = vrot.slane %v446_v57, 4 }
  0xdb   : > { %v448_v50 = vmin.f32 %v446_v57, %v447_v48 }
  0xdd   : > { %v449_v49 = vrot.slane %v448_v50, 2 }
  0xdf   : > { %v450_v51 = vmin.f32 %v448_v50, %v449_v49  ;;  %455 = sbr.rel (%p1006_p12) target bundleno = 232 (0xe8), region = 36 }
  0xe1   : > { %v451_v58 = vrot.slane %v450_v51, 1 }
  0xe3   : > { %v452_v59 = vmin.f32 %v450_v51, %v451_v58 }
  0xe4   : > { %456 = vst [vmem:[#allocation2 + $0x30] sm:$0xff] %v432_v43  ;;  %457 = vst [vmem:[#allocation2] sm:$0xff] %v433_v39 }
  0xe5   : > { %458 = vst [vmem:[#allocation2 + $0x18] sm:$0xff] %v434_v44  ;;  %459 = vst [vmem:[#allocation2 + $0x10] sm:$0xff] %v435_v45 }
  0xe6   : > { %460 = vst [vmem:[#allocation2 + $0x8] sm:$0xff] %v436_v40  ;;  %461 = vst [vmem:[#allocation2 + $0x20] sm:$0xff] %v437_v33 }
  0xe7   : > { %462 = vst [vmem:[#allocation2 + $0x28] sm:$0xff] %v438_v41  ;;  %463 = vst [vmem:[#allocation2 + $0x38] sm:$0xff] %v439_v47 }
  0xe8 PF: > { %467 = sbr.rel (%p243_p10) target bundleno = 244 (0xf4), region = 40 }
  0xed   : > { %v470_v62 = vld [vmem:[#allocation2 + $0x18] sm:$0xff]  ;;  %v471_v2 = vld [vmem:[#allocation2 + $0x10] sm:$0xff]  ;;  %v472_v3 = vld [vmem:[#allocation2 + $0x8] sm:$0xff] }
  0xee   : > { %v478_v1 = vmin.f32 %v470_v62, %v434_v44  ;;  %v473_v4 = vld [vmem:[#allocation2 + $0x20] sm:$0xff]  ;;  %v479_v5 = vmin.f32 %v471_v2, %v435_v45  ;;  %v480_v6 = vmin.f32 %v472_v3, %v436_v40  ;;  %v474_v8 = vld [vmem:[#allocation2 + $0x28] sm:$0xff]  ;;  %v475_v9 = vld [vmem:[#allocation2 + $0x38] sm:$0xff] }
  0xef   : > { %v468_v60 = vld [vmem:[#allocation2 + $0x30] sm:$0xff]  ;;  %v469_v61 = vld [vmem:[#allocation2] sm:$0xff]  ;;  %v481_v7 = vmin.f32 %v473_v4, %v437_v33  ;;  %v482_v10 = vmin.f32 %v474_v8, %v438_v41  ;;  %v483_v11 = vmin.f32 %v475_v9, %v439_v47 }
  0xf0   : > { %v476_v63 = vmin.f32 %v468_v60, %v432_v43  ;;  %v477_v0 = vmin.f32 %v469_v61, %v433_v39  ;;  %486 = vst [vmem:[#allocation2 + $0x18] sm:$0xff] %v478_v1  ;;  %487 = vst [vmem:[#allocation2 + $0x10] sm:$0xff] %v479_v5 }
  0xf1   : > { %488 = vst [vmem:[#allocation2 + $0x8] sm:$0xff] %v480_v6  ;;  %489 = vst [vmem:[#allocation2 + $0x20] sm:$0xff] %v481_v7 }
  0xf2   : > { %484 = vst [vmem:[#allocation2 + $0x30] sm:$0xff] %v476_v63  ;;  %485 = vst [vmem:[#allocation2] sm:$0xff] %v477_v0 }
  0xf3   : > { %490 = vst [vmem:[#allocation2 + $0x28] sm:$0xff] %v482_v10  ;;  %491 = vst [vmem:[#allocation2 + $0x38] sm:$0xff] %v483_v11 }
  0xf4 PF: > { %s1330_s14 = sshll.u32 %s1194_s12, 7  ;;  %p1009_p13 = scmp.ne.s32.totalorder %s1198_s13, 0 }
  0xf5   : > { %s496_s24 = sshra.s32 (!%p1009_p13), %s1330_s14, 7 }
  0xf6   : > { %495 = sbr.rel (%p1009_p13) target bundleno = 253 (0xfd), region = 44  ;;  %s498_s26 = scalar_lea.vmem (!%p1009_p13), [#allocation3], %s496_s24 }
  0xfb   : > { %vm501_vm1 = vcmp.lt.s32.totalorder %v364_v22, 128 }
  0xfc   : > { %503 = vst.msk [vmem:[%s498_s26] sm:$0x1] %vm501_vm1, %v452_v59 }
  0xfd PF: > { %507 = sbr.rel (%p242_p9) target bundleno = 263 (0x107), region = 48  ;;  %s508_s27 = sshra.s32 (!%p242_p9), %s1330_s14, 7 }
  0xfe   : > { %s510_s29 = scalar_lea.vmem (!%p242_p9), [#allocation3], %s508_s27 }
 0x102   : > { %vm515_vm2 = vcmp.lt.s32.totalorder %v364_v22, 128 }
 0x103   : > { %v511_v12 = vld [vmem:[%s510_s29] sm:$0x1] }
 0x104   : > { %v512_v13 = vmin.f32 %v511_v12, %v452_v59 }
 0x106   : > { %517 = vst.msk [vmem:[%s510_s29] sm:$0x1] %vm515_vm2, %v512_v13 }
 0x107 PF: > { %p1011_p0 = scmp.ne.s32.totalorder %s1194_s12, 2 }
 0x108   : > { %s1020_s12 = sshll.u32 (!%p1011_p0), %s1198_s13, 6 }
 0x109   : > { %521 = sbr.rel (%p1011_p0) target bundleno = 522 (0x20a), region = 52 }
 0x10e   : > { %v524_v14 = vld [vmem:[#allocation2 + $0x18] sm:$0xff]  ;;  %v522_v15 = vld [vmem:[#allocation2 + $0x30] sm:$0xff]  ;;  %v523_v17 = vld [vmem:[#allocation2] sm:$0xff] }
 0x10f   : > { %534 = vmin.xlane.f32.xlu1 %v524_v14  ;;  %530 = vmin.xlane.f32.xlu0 %v522_v15  ;;  %v525_v16 = vld [vmem:[#allocation2 + $0x10] sm:$0xff]  ;;  %v527_v18 = vld [vmem:[#allocation2 + $0x20] sm:$0xff]  ;;  %v526_v19 = vld [vmem:[#allocation2 + $0x8] sm:$0xff] }
 0x110   : > { %v529_v20 = vld [vmem:[#allocation2 + $0x38] sm:$0xff]  ;;  %v528_v21 = vld [vmem:[#allocation2 + $0x28] sm:$0xff] }
 0x113   : > { %536 = vmin.xlane.f32.xlu1 %v525_v16  ;;  %532 = vmin.xlane.f32.xlu0 %v523_v17 }
 0x117   : > { %540 = vmin.xlane.f32.xlu1 %v527_v18  ;;  %538 = vmin.xlane.f32.xlu0 %v526_v19 }
 0x11b   : > { %544 = vmin.xlane.f32.xlu1 %v529_v20  ;;  %542 = vmin.xlane.f32.xlu0 %v528_v21 }
 0x198   : > { %v535_v23 = vpop.xlane.xlu1 %534  ;;  %v531_v24 = vpop.xlane.xlu0 %530 }
 0x199   : > { %1092 = vrsqrt.f32 %v535_v23  ;;  %vm562_vm3 = vcmp.eq.f32.partialorder %v535_v23, inf  ;;  %v565_v34 = vand.u32 2147483648, %v535_v23  ;;  %vm564_vm4 = vcmp.eq.f32.partialorder %v535_v23, 0.0 }
 0x19a   : > { %1094 = vrsqrt.f32 %v531_v24  ;;  %vm548_vm5 = vcmp.eq.f32.partialorder %v531_v24, inf  ;;  %v551_v37 = vand.u32 2147483648, %v531_v24  ;;  %vm550_vm6 = vcmp.eq.f32.partialorder %v531_v24, 0.0 }
 0x19c   : > { %v537_v26 = vpop.xlane.xlu1 %536  ;;  %v533_v27 = vpop.xlane.xlu0 %532 }
 0x19d   : > { %1096 = vrsqrt.f32 %v537_v26  ;;  %vm569_vm7 = vcmp.eq.f32.partialorder %v537_v26, inf  ;;  %vm571_vm8 = vcmp.eq.f32.partialorder %v537_v26, 0.0  ;;  %v572_v47 = vand.u32 2147483648, %v537_v26 }
 0x19e   : > { %1098 = vrsqrt.f32 %v533_v27  ;;  %vm555_vm9 = vcmp.eq.f32.partialorder %v533_v27, inf  ;;  %v558_v55 = vand.u32 2147483648, %v533_v27  ;;  %vm557_vm10 = vcmp.eq.f32.partialorder %v533_v27, 0.0 }
 0x1a0   : > { %v541_v28 = vpop.xlane.xlu1 %540  ;;  %v1340_v29 = vpop.xlane.xlu0 %538 }
 0x1a1   : > { %1100 = vrsqrt.f32 %v541_v28  ;;  %vm583_vm11 = vcmp.eq.f32.partialorder %v541_v28, inf  ;;  %v586_v2 = vand.u32 2147483648, %v541_v28  ;;  %vm585_vm12 = vcmp.eq.f32.partialorder %v541_v28, 0.0 }
 0x1a2   : > { %1102 = vrsqrt.f32 %v1340_v29  ;;  %vm576_vm13 = vcmp.eq.f32.partialorder %v1340_v29, inf  ;;  %vm578_vm15 = vcmp.eq.f32.partialorder %v1340_v29, 0.0  ;;  %v579_v17 = vand.u32 2147483648, %v1340_v29 }
 0x1a4   : > { %v1342_v30 = vpop.xlane.xlu1 %544  ;;  %v1346_v38 = vpop.xlane.xlu0 %542 }
 0x1a5   : > { %1104 = vrsqrt.f32 %v1342_v30  ;;  %vm597_vm14 = vcmp.eq.f32.partialorder %v1342_v30, inf  ;;  %v600_v18 = vand.u32 2147483648, %v1342_v30  ;;  %vm599_vm0 = vcmp.eq.f32.partialorder %v1342_v30, 0.0 }
 0x1a6   : > { %v1093_v31 = vpop.eup %1092  ;;  %1106 = vrsqrt.f32 %v1346_v38  ;;  %vm590_vm1 = vcmp.eq.f32.partialorder %v1346_v38, inf  ;;  %vm592_vm2 = vcmp.eq.f32.partialorder %v1346_v38, 0.0 }
 0x1a7   : > { %v1095_v32 = vpop.eup %1094  ;;  %v561_v33 = vmul.f32 %v1093_v31, %v535_v23 }
 0x1a8   : > { %v547_v35 = vmul.f32 %v1095_v32, %v531_v24 }
 0x1a9   : > { %v563_v36 = vsel %vm562_vm3, %v535_v23, %v561_v33 }
 0x1aa   : > { %v1097_v39 = vpop.eup %1096  ;;  %v566_v40 = vsel %vm564_vm4, %v565_v34, %v563_v36  ;;  %v549_v41 = vsel %vm548_vm5, %v531_v24, %v547_v35 }
 0x1ab   : > { %v1099_v42 = vpop.eup %1098  ;;  %v604_v43 = vadd.f32 1.0, %v566_v40  ;;  %v552_v44 = vsel %vm550_vm6, %v551_v37, %v549_v41  ;;  %v568_v45 = vmul.f32 %v1097_v39, %v537_v26 }
 0x1ac   : > { %v602_v46 = vadd.f32 1.0, %v552_v44  ;;  %v554_v52 = vmul.f32 %v1099_v42, %v533_v27 }
 0x1ad   : > { %v1349_v53 = vmax.f32 %v604_v43, 1.00001  ;;  %v570_v54 = vsel %vm569_vm7, %v537_v26, %v568_v45 }
 0x1ae   : > { %v1101_v56 = vpop.eup %1100  ;;  %v1351_v57 = vmax.f32 %v602_v46, 1.00001  ;;  %v573_v48 = vsel %vm571_vm8, %v572_v47, %v570_v54  ;;  %v556_v50 = vsel %vm555_vm9, %v533_v27, %v554_v52 }
 0x1af   : > { %v1354_v49 = vadd.f32 1.0, %v1349_v53  ;;  %v1357_v51 = vadd.f32 -1.0, %v1349_v53  ;;  %v559_v58 = vsel %vm557_vm10, %v558_v55, %v556_v50  ;;  %v605_v61 = vadd.f32 1.0, %v573_v48  ;;  %v1103_v0 = vpop.eup %1102 }
 0x1b0   : > { %v1360_v59 = vadd.f32 1.0, %v1351_v57  ;;  %v1363_v60 = vadd.f32 -1.0, %v1351_v57  ;;  %v603_v62 = vadd.f32 1.0, %v559_v58  ;;  %v582_v63 = vmul.f32 %v1101_v56, %v541_v28 }
 0x1b1   : > { %1108 = vrsqrt.f32 %v1354_v49  ;;  %v1369_v3 = vmax.f32 %v605_v61, 1.00001  ;;  %v575_v7 = vmul.f32 %v1103_v0, %v1340_v29  ;;  %vm642_vm3 = vcmp.eq.f32.partialorder %v1354_v49, inf }
 0x1b2   : > { %1110 = vrsqrt.f32 %v1357_v51  ;;  %v1105_v1 = vpop.eup %1104  ;;  %v1371_v4 = vmax.f32 %v603_v62, 1.00001  ;;  %v584_v5 = vsel %vm583_vm11, %v541_v28, %v582_v63  ;;  %v645_v26 = vand.u32 2147483648, %v1354_v49 }
 0x1b3   : > { %1112 = vrsqrt.f32 %v1360_v59  ;;  %v587_v6 = vsel %vm585_vm12, %v586_v2, %v584_v5  ;;  %v596_v8 = vmul.f32 %v1105_v1, %v1342_v30  ;;  %v1376_v9 = vadd.f32 1.0, %v1369_v3  ;;  %v1107_v13 = vpop.eup %1106 }
 0x1b4   : > { %1114 = vrsqrt.f32 %v1363_v60  ;;  %v1379_v10 = vadd.f32 -1.0, %v1369_v3  ;;  %v1382_v11 = vadd.f32 1.0, %v1371_v4  ;;  %v1385_v12 = vadd.f32 -1.0, %v1371_v4 }
 0x1b5   : > { %1116 = vrsqrt.f32 %v1376_v9  ;;  %v607_v14 = vadd.f32 1.0, %v587_v6  ;;  %v577_v15 = vsel %vm576_vm13, %v1340_v29, %v575_v7  ;;  %v598_v16 = vsel %vm597_vm14, %v1342_v30, %v596_v8 }
 0x1b6   : > { %1118 = vrsqrt.f32 %v1379_v10  ;;  %v589_v19 = vmul.f32 %v1107_v13, %v1346_v38  ;;  %v580_v21 = vsel %vm578_vm15, %v579_v17, %v577_v15  ;;  %v601_v23 = vsel %vm599_vm0, %v600_v18, %v598_v16 }
 0x1b7   : > { %1120 = vrsqrt.f32 %v1382_v11  ;;  %v1401_v20 = vmax.f32 %v607_v14, 1.00001  ;;  %v606_v27 = vadd.f32 1.0, %v580_v21  ;;  %v593_v28 = vand.u32 2147483648, %v1346_v38 }
 0x1b8   : > { %1122 = vrsqrt.f32 %v1385_v12  ;;  %vm706_vm4 = vcmp.eq.f32.partialorder %v1357_v51, inf  ;;  %v709_v30 = vand.u32 2147483648, %v1357_v51  ;;  %vm628_vm5 = vcmp.eq.f32.partialorder %v1360_v59, inf }
 0x1b9   : > { %v1410_v31 = vadd.f32 1.0, %v1401_v20  ;;  %v1413_v32 = vadd.f32 -1.0, %v1401_v20  ;;  %vm630_vm6 = vcmp.eq.f32.partialorder %v1360_v59, 0.0  ;;  %v609_v34 = vadd.f32 1.0, %v601_v23 }
 0x1ba   : > { %v591_v35 = vsel %vm590_vm1, %v1346_v38, %v589_v19  ;;  %vm644_vm7 = vcmp.eq.f32.partialorder %v1354_v49, 0.0  ;;  %v631_v39 = vand.u32 2147483648, %v1360_v59  ;;  %v1424_v40 = vmax.f32 %v606_v27, 1.00001 }
 0x1bb   : > { %1124 = vrsqrt.f32 %v1410_v31  ;;  %vm708_vm8 = vcmp.eq.f32.partialorder %v1357_v51, 0.0  ;;  %vm692_vm9 = vcmp.eq.f32.partialorder %v1363_v60, inf  ;;  %vm694_vm10 = vcmp.eq.f32.partialorder %v1363_v60, 0.0 }
 0x1bc   : > { %v695_v42 = vand.u32 2147483648, %v1363_v60  ;;  %1126 = vrsqrt.f32 %v1413_v32  ;;  %v594_v45 = vsel %vm592_vm2, %v593_v28, %v591_v35  ;;  %v1442_v54 = vmax.f32 %v609_v34, 1.00001 }
 0x1bd   : > { %vm649_vm11 = vcmp.eq.f32.partialorder %v1376_v9, inf  ;;  %vm713_vm12 = vcmp.eq.f32.partialorder %v1379_v10, inf  ;;  %v1447_v56 = vadd.f32 1.0, %v1424_v40  ;;  %vm635_vm13 = vcmp.eq.f32.partialorder %v1382_v11, inf }
 0x1be   : > { %v1109_v24 = vpop.eup %1108  ;;  %vm637_vm14 = vcmp.eq.f32.partialorder %v1382_v11, 0.0  ;;  %v1452_v38 = vadd.f32 -1.0, %v1424_v40  ;;  %v608_v50 = vadd.f32 1.0, %v594_v45  ;;  %v638_v1 = vand.u32 2147483648, %v1382_v11 }
 0x1bf   : > { %v1111_v29 = vpop.eup %1110  ;;  %v641_v43 = vmul.f32 %v1109_v24, %v1354_v49  ;;  %1128 = vrsqrt.f32 %v1447_v56  ;;  %v1465_v2 = vadd.f32 1.0, %v1442_v54  ;;  %vm699_vm15 = vcmp.eq.f32.partialorder %v1385_v12, inf }
 0x1c0   : > { %v1113_v33 = vpop.eup %1112  ;;  %v705_v46 = vmul.f32 %v1111_v29, %v1357_v51  ;;  %vm701_vm0 = vcmp.eq.f32.partialorder %v1385_v12, 0.0  ;;  %1130 = vrsqrt.f32 %v1452_v38  ;;  %v702_v13 = vand.u32 2147483648, %v1385_v12 }
 0x1c1   : > { %v1115_v36 = vpop.eup %1114  ;;  %v627_v37 = vmul.f32 %v1113_v33, %v1360_v59  ;;  %v1475_v14 = vmax.f32 %v608_v50, 1.00001  ;;  %1132 = vrsqrt.f32 %v1465_v2  ;;  %vm651_vm1 = vcmp.eq.f32.partialorder %v1376_v9, 0.0 }
 0x1c2   : > { %v691_v41 = vmul.f32 %v1115_v36, %v1363_v60  ;;  %v1117_v48 = vpop.eup %1116  ;;  %v707_v63 = vsel %vm706_vm4, %v1357_v51, %v705_v46  ;;  %v716_v21 = vand.u32 2147483648, %v1379_v10  ;;  %vm715_vm2 = vcmp.eq.f32.partialorder %v1379_v10, 0.0 }
 0x1c3   : > { %v629_v44 = vsel %vm628_vm5, %v1360_v59, %v627_v37  ;;  %v1119_v58 = vpop.eup %1118  ;;  %v643_v59 = vsel %vm642_vm3, %v1354_v49, %v641_v43  ;;  %v648_v61 = vmul.f32 %v1117_v48, %v1376_v9  ;;  %v710_v15 = vsel %vm708_vm8, %v709_v30, %v707_v63 }
 0x1c4   : > { %v632_v47 = vsel %vm630_vm6, %v631_v39, %v629_v44  ;;  %v693_v52 = vsel %vm692_vm9, %v1363_v60, %v691_v41  ;;  %v1121_v62 = vpop.eup %1120  ;;  %v712_v0 = vmul.f32 %v1119_v58, %v1379_v10  ;;  %v646_v7 = vsel %vm644_vm7, %v645_v26, %v643_v59 }
 0x1c5   : > { %v696_v55 = vsel %vm694_vm10, %v695_v42, %v693_v52  ;;  %v1123_v5 = vpop.eup %1122  ;;  %v634_v6 = vmul.f32 %v1121_v62, %v1382_v11  ;;  %v650_v17 = vsel %vm649_vm11, %v1376_v9, %v648_v61  ;;  %v748_v26 = vmul.f32 %v710_v15, %v646_v7 }
 0x1c6   : > { %v746_v60 = vmul.f32 %v696_v55, %v632_v47  ;;  %v698_v8 = vmul.f32 %v1123_v5, %v1385_v12  ;;  %v714_v18 = vsel %vm713_vm12, %v1379_v10, %v712_v0  ;;  %v1501_v27 = vadd.f32 -1.0, %v1442_v54 }
 0x1c7   : > { %v636_v49 = vsel %vm635_vm13, %v1382_v11, %v634_v6  ;;  %v717_v29 = vsel %vm715_vm2, %v716_v21, %v714_v18  ;;  %v1504_v30 = vadd.f32 1.0, %v1475_v14  ;;  %v1509_v34 = vadd.f32 -1.0, %v1475_v14 }
 0x1c8   : > { %v754_v16 = vadd.f32 %v746_v60, %v1351_v57  ;;  %v639_v19 = vsel %vm637_vm14, %v638_v1, %v636_v49  ;;  %v700_v51 = vsel %vm699_vm15, %v1385_v12, %v698_v8  ;;  %v652_v57 = vand.u32 2147483648, %v1376_v9  ;;  %v1125_v24 = vpop.eup %1124 }
 0x1c9   : > { %v703_v23 = vsel %vm701_vm0, %v702_v13, %v700_v51  ;;  %v1127_v9 = vpop.eup %1126  ;;  %v662_v12 = vmul.f32 %v1125_v24, %v1410_v31  ;;  %v1511_v35 = vstv %s1020_s12  ;;  %v756_v36 = vadd.f32 %v748_v26, %v1349_v53 }
 0x1ca   : > { %v747_v11 = vmul.f32 %v703_v23, %v639_v19  ;;  %v653_v28 = vsel %vm651_vm1, %v652_v57, %v650_v17  ;;  %1134 = vlog2.f32 %v754_v16  ;;  %v726_v10 = vmul.f32 %v1127_v9, %v1413_v32 }
 0x1cb   : > { %1136 = vrsqrt.f32 %v1501_v27  ;;  %v749_v37 = vmul.f32 %v717_v29, %v653_v28  ;;  %v781_v39 = vadd.s32 8, %v1320_v25  ;;  %vm663_vm3 = vcmp.eq.f32.partialorder %v1410_v31, inf }
 0x1cc   : > { %v755_v33 = vadd.f32 %v747_v11, %v1371_v4  ;;  %vm665_vm4 = vcmp.eq.f32.partialorder %v1410_v31, 0.0  ;;  %vm727_vm5 = vcmp.eq.f32.partialorder %v1413_v32, inf  ;;  %v1129_v4 = vpop.eup %1128  ;;  %v664_v41 = vsel %vm663_vm3, %v1410_v31, %v662_v12 }
 0x1cd   : > { %v666_v42 = vand.u32 2147483648, %v1410_v31  ;;  %v728_v43 = vsel %vm727_vm5, %v1413_v32, %v726_v10  ;;  %vm729_vm6 = vcmp.eq.f32.partialorder %v1413_v32, 0.0  ;;  %v730_v53 = vand.u32 2147483648, %v1413_v32  ;;  %v1131_v45 = vpop.eup %1130 }
 0x1ce   : > { %1138 = vlog2.f32 %v755_v33  ;;  %v655_v44 = vmul.f32 %v1129_v4, %v1447_v56  ;;  %vm656_vm7 = vcmp.eq.f32.partialorder %v1447_v56, inf  ;;  %v757_v46 = vadd.f32 %v749_v37, %v1369_v3  ;;  %v1133_v3 = vpop.eup %1132 }
 0x1cf   : > { %1140 = vrsqrt.f32 %v1504_v30  ;;  %vm658_vm8 = vcmp.eq.f32.partialorder %v1447_v56, 0.0  ;;  %v659_v47 = vand.u32 2147483648, %v1447_v56  ;;  %v667_v52 = vsel %vm665_vm4, %v666_v42, %v664_v41 }
 0x1d0   : > { %1142 = vrsqrt.f32 %v1509_v34  ;;  %v731_v55 = vsel %vm729_vm6, %v730_v53, %v728_v43  ;;  %v657_v48 = vsel %vm656_vm7, %v1447_v56, %v655_v44  ;;  %v719_v32 = vmul.f32 %v1131_v45, %v1452_v38 }
 0x1d1   : > { %1144 = vlog2.f32 %v756_v36  ;;  %v782_v50 = vadd.s32 16, %v1320_v25  ;;  %v660_v58 = vsel %vm658_vm8, %v659_v47, %v657_v48  ;;  %vm720_vm9 = vcmp.eq.f32.partialorder %v1452_v38, inf }
 0x1d2   : > { %v723_v59 = vand.u32 2147483648, %v1452_v38  ;;  %v789_v60 = vadd.s32 %v1511_v35, %v1320_v25  ;;  %v790_v61 = vadd.s32 %v1511_v35, %v781_v39  ;;  %v721_v31 = vsel %vm720_vm9, %v1452_v38, %v719_v32 }
 0x1d3   : > { %vm722_vm10 = vcmp.eq.f32.partialorder %v1452_v38, 0.0  ;;  %1146 = vlog2.f32 %v757_v46  ;;  %v751_v56 = vmul.f32 %v731_v55, %v667_v52  ;;  %v676_v63 = vmul.f32 %v1133_v3, %v1465_v2 }
 0x1d4   : > { %v724_v62 = vsel %vm722_vm10, %v723_v59, %v721_v31  ;;  %v791_v1 = vadd.s32 %v1511_v35, %v782_v50  ;;  %vm677_vm11 = vcmp.eq.f32.partialorder %v1465_v2, inf  ;;  %vm797_vm12 = vcmp.lt.s32.totalorder %v789_v60, 200 }
 0x1d5   : > { %v750_v0 = vmul.f32 %v724_v62, %v660_v58  ;;  %v783_v6 = vadd.s32 24, %v1320_v25  ;;  %v678_v8 = vsel %vm677_vm11, %v1465_v2, %v676_v63  ;;  %vm798_vm13 = vcmp.lt.s32.totalorder %v790_v61, 200 }
 0x1d6   : > { %v759_v38 = vadd.f32 %v751_v56, %v1401_v20  ;;  %vm679_vm14 = vcmp.eq.f32.partialorder %v1465_v2, 0.0  ;;  %v680_v15 = vand.u32 2147483648, %v1465_v2  ;;  %vm741_vm15 = vcmp.eq.f32.partialorder %v1501_v27, inf }
 0x1d7   : > { %v1135_v5 = vpop.eup %1134  ;;  %v758_v7 = vadd.f32 %v750_v0, %v1424_v40  ;;  %vm743_vm0 = vcmp.eq.f32.partialorder %v1501_v27, 0.0  ;;  %v744_v19 = vand.u32 2147483648, %v1501_v27  ;;  %vm670_vm1 = vcmp.eq.f32.partialorder %v1504_v30, inf }
 0x1d8   : > { %v1137_v13 = vpop.eup %1136  ;;  %v681_v18 = vsel %vm679_vm14, %v680_v15, %v678_v8  ;;  %vm672_vm2 = vcmp.eq.f32.partialorder %v1504_v30, 0.0  ;;  %v673_v57 = vand.u32 2147483648, %v1504_v30  ;;  %v763_v21 = vmul.f32 0.6931472, %v1135_v5 }
 0x1d9   : > { %1148 = vlog2.f32 %v758_v7  ;;  %v740_v17 = vmul.f32 %v1137_v13, %v1501_v27  ;;  %vm734_vm3 = vcmp.eq.f32.partialorder %v1509_v34, inf  ;;  %v737_v29 = vand.u32 2147483648, %v1509_v34 }
 0x1da   : > { %1150 = vlog2.f32 %v759_v38  ;;  %vm736_vm4 = vcmp.eq.f32.partialorder %v1509_v34, 0.0  ;;  %v805_v37 = vsel %vm797_vm12, %v763_v21, 0.0  ;;  %vm799_vm5 = vcmp.lt.s32.totalorder %v791_v1, 200 }
 0x1db   : > { %v1139_v16 = vpop.eup %1138  ;;  %v742_v51 = vsel %vm741_vm15, %v1501_v27, %v740_v17  ;;  %v784_v42 = vadd.s32 32, %v1320_v25  ;;  %v786_v50 = vadd.s32 48, %v1320_v25  ;;  %v813_v17 = vld [vmem:[%s1295_s28] sm:$0x1]  ;;  %vm828_vm11 = vcmask 0  }
 0x1dc   : > { %v1141_v49 = vpop.eup %1140  ;;  %v765_v40 = vmul.f32 0.6931472, %v1139_v16  ;;  %v745_v23 = vsel %vm743_vm0, %v744_v19, %v742_v51 }
 0x1dd   : > { %v1143_v20 = vpop.eup %1142  ;;  %v669_v2 = vmul.f32 %v1141_v49, %v1504_v30  ;;  %v753_v11 = vmul.f32 %v745_v23, %v681_v18  ;;  %v793_v45 = vadd.s32 %v1511_v35, %v784_v42  ;;  %v795_v60 = vadd.s32 %v1511_v35, %v786_v50 }
 0x1de   : > { %v733_v24 = vmul.f32 %v1143_v20, %v1509_v34  ;;  %v1145_v26 = vpop.eup %1144  ;;  %v806_v27 = vsel %vm798_vm13, %v765_v40, 0.0 }
 0x1df   : > { %v671_v28 = vsel %vm670_vm1, %v1504_v30, %v669_v2  ;;  %v761_v12 = vadd.f32 %v753_v11, %v1442_v54  ;;  %v767_v36 = vmul.f32 0.6931472, %v1145_v26  ;;  %v792_v30 = vadd.s32 %v1511_v35, %v783_v6 }
 0x1e0   : > { %v674_v9 = vsel %vm672_vm2, %v673_v57, %v671_v28  ;;  %v735_v33 = vsel %vm734_vm3, %v1509_v34, %v733_v24  ;;  %v1147_v4 = vpop.eup %1146  ;;  %v814_v41 = vadd.f32 %v806_v27, %v805_v37  ;;  %v785_v34 = vadd.s32 40, %v1320_v25 }
 0x1e1   : > { %v738_v10 = vsel %vm736_vm4, %v737_v29, %v735_v33  ;;  %1152 = vlog2.f32 %v761_v12  ;;  %v807_v53 = vsel %vm799_vm5, %v767_v36, 0.0  ;;  %v769_v44 = vmul.f32 0.6931472, %v1147_v4 }
 0x1e2   : > { %v752_v39 = vmul.f32 %v738_v10, %v674_v9  ;;  %vm800_vm6 = vcmp.lt.s32.totalorder %v792_v30, 200  ;;  %v815_v54 = vadd.f32 %v814_v41, %v807_v53  ;;  %v794_v48 = vadd.s32 %v1511_v35, %v785_v34 }
 0x1e3   : > { %v808_v47 = vsel %vm800_vm6, %v769_v44, 0.0  ;;  %vm801_vm7 = vcmp.lt.s32.totalorder %v793_v45, 200  ;;  %vm803_vm9 = vcmp.lt.s32.totalorder %v795_v60, 200 }
 0x1e4   : > { %v760_v43 = vadd.f32 %v752_v39, %v1475_v14  ;;  %v816_v32 = vadd.f32 %v815_v54, %v808_v47  ;;  %v787_v14 = vadd.s32 56, %v1320_v25  ;;  %vm802_vm8 = vcmp.lt.s32.totalorder %v794_v48, 200 }
 0x1e6   : > { %1154 = vlog2.f32 %v760_v43  ;;  %v1149_v46 = vpop.eup %1148  ;;  %v796_v31 = vadd.s32 %v1511_v35, %v787_v14 }
 0x1e7   : > { %v771_v52 = vmul.f32 0.6931472, %v1149_v46  ;;  %v1151_v55 = vpop.eup %1150 }
 0x1e8   : > { %v773_v58 = vmul.f32 0.6931472, %v1151_v55  ;;  %vm804_vm10 = vcmp.lt.s32.totalorder %v796_v31, 200 }
 0x1e9   : > { %v809_v59 = vsel %vm801_vm7, %v771_v52, 0.0 }
 0x1ea   : > { %v817_v3 = vadd.f32 %v816_v32, %v809_v59  ;;  %v810_v56 = vsel %vm802_vm8, %v773_v58, 0.0 }
 0x1ec   : > { %v818_v63 = vadd.f32 %v817_v3, %v810_v56 }
 0x1ee   : > { %v1153_v61 = vpop.eup %1152 }
 0x1ef   : > { %v777_v0 = vmul.f32 0.6931472, %v1153_v61 }
 0x1f1   : > { %v812_v6 = vsel %vm804_vm10, %v777_v0, 0.0 }
 0x1f3   : > { %v1155_v62 = vpop.eup %1154 }
 0x1f4   : > { %v775_v1 = vmul.f32 0.6931472, %v1155_v62 }
 0x1f6   : > { %v811_v5 = vsel %vm803_vm9, %v775_v1, 0.0 }
 0x1f7   : > { %v819_v25 = vadd.f32 %v818_v63, %v811_v5 }
 0x1f9   : > { %v820_v7 = vadd.f32 %v819_v25, %v812_v6 }
 0x1fb   : > { %v821_v8 = vrot.slane %v820_v7, 4 }
 0x1fd   : > { %v822_v13 = vadd.f32 %v821_v8, %v820_v7 }
 0x1ff   : > { %v823_v38 = vrot.slane %v822_v13, 2 }
 0x201   : > { %v824_v15 = vadd.f32 %v823_v38, %v822_v13 }
 0x203   : > { %v825_v16 = vrot.slane %v824_v15, 1 }
 0x205   : > { %v826_v35 = vadd.f32 %v825_v16, %v824_v15 }
 0x207   : > { %v827_v49 = vadd.f32 %v826_v35, %v813_v17 }
 0x209   : > { %829 = vst.msk [vmem:[%s1295_s28] sm:$0x1] %vm828_vm11, %v827_v49 }
 0x20a PF: > { %p1021_p1 = scmp.ne.s32.totalorder %s1198_s13, 3 }
 0x20b   : > { %s834_s30 = sshra.s32 (!%p1021_p1), %s1330_s14, 7 }
 0x20c   : > { %833 = sbr.rel (%p1021_p1) target bundleno = 736 (0x2e0), region = 56  ;;  %s836_s4 = scalar_lea.vmem (!%p1021_p1), [#allocation3], %s834_s30 }
 0x211   : > { %v837_v40 = vld [vmem:[%s836_s4] sm:$0x1]  ;;  %v868_v4 = vand.u32 127, %v364_v22  ;;  %v869_v30 = vstv %s1330_s14  ;;  %vm874_vm3 = vcmask 1040384   ;;  %vm879_vm4 = vcmask 0  }
 0x212   : > { %1156 = vrsqrt.f32 %v837_v40  ;;  %vm840_vm12 = vcmp.eq.f32.partialorder %v837_v40, inf  ;;  %v843_v19 = vand.u32 2147483648, %v837_v40  ;;  %vm842_vm13 = vcmp.eq.f32.partialorder %v837_v40, 0.0  ;;  %v873_v54 = vld [vmem:[%s1300_s5] sm:$0x1] }
 0x213   : > { %v870_v41 = vadd.s32 %v869_v30, %v868_v4 }
 0x215   : > { %vm871_vm2 = vcmp.lt.s32.totalorder %v870_v41, 300 }
 0x21f   : > { %v1157_v18 = vpop.eup %1156 }
 0x220   : > { %v839_v20 = vmul.f32 %v1157_v18, %v837_v40 }
 0x222   : > { %v841_v51 = vsel %vm840_vm12, %v837_v40, %v839_v20 }
 0x223   : > { %v844_v2 = vsel %vm842_vm13, %v843_v19, %v841_v51 }
 0x224   : > { %v845_v57 = vadd.f32 1.0, %v844_v2 }
 0x226   : > { %v846_v21 = vmax.f32 %v845_v57, 1.00001 }
 0x228   : > { %v847_v23 = vadd.f32 1.0, %v846_v21  ;;  %v1022_v24 = vadd.f32 -1.0, %v846_v21 }
 0x22a   : > { %1158 = vrsqrt.f32 %v847_v23  ;;  %vm850_vm14 = vcmp.eq.f32.partialorder %v847_v23, inf  ;;  %v853_v11 = vand.u32 2147483648, %v847_v23  ;;  %vm852_vm15 = vcmp.eq.f32.partialorder %v847_v23, 0.0 }
 0x22b   : > { %1160 = vrsqrt.f32 %v1022_v24  ;;  %vm858_vm0 = vcmp.eq.f32.partialorder %v1022_v24, inf  ;;  %v861_v27 = vand.u32 2147483648, %v1022_v24  ;;  %vm860_vm1 = vcmp.eq.f32.partialorder %v1022_v24, 0.0 }
 0x237   : > { %v1159_v26 = vpop.eup %1158 }
 0x238   : > { %v1161_v28 = vpop.eup %1160  ;;  %v849_v29 = vmul.f32 %v1159_v26, %v847_v23 }
 0x239   : > { %v857_v9 = vmul.f32 %v1161_v28, %v1022_v24 }
 0x23a   : > { %v851_v33 = vsel %vm850_vm14, %v847_v23, %v849_v29 }
 0x23b   : > { %v854_v12 = vsel %vm852_vm15, %v853_v11, %v851_v33  ;;  %v859_v10 = vsel %vm858_vm0, %v1022_v24, %v857_v9 }
 0x23c   : > { %v862_v36 = vsel %vm860_vm1, %v861_v27, %v859_v10 }
 0x23d   : > { %v863_v37 = vmul.f32 %v862_v36, %v854_v12 }
 0x23f   : > { %v864_v39 = vadd.f32 %v863_v37, %v846_v21 }
 0x241   : > { %1162 = vlog2.f32 %v864_v39 }
 0x24e   : > { %v1163_v42 = vpop.eup %1162 }
 0x24f   : > { %v866_v43 = vmul.f32 0.6931472, %v1163_v42 }
 0x251   : > { %v872_v53 = vsel %vm871_vm2, %v866_v43, 0.0 }
 0x252   : > { %v875_v44 = vsel %vm874_vm3, %v872_v53, 0.0 }
 0x253   : > { %876 = vadd.xlane.f32.xlu0 %v875_v44 }
 0x2dc   : > { %v877_v34 = vpop.xlane.xlu0 %876 }
 0x2dd   : > { %v878_v45 = vadd.f32 %v877_v34, %v873_v54 }
 0x2df   : > { %880 = vst.msk [vmem:[%s1300_s5] sm:$0x1] %vm879_vm4, %v878_v45 }
 0x2e0 PF: > { %s14_s18 = sadd.s32 1, %s1218_s18   ;;  %s1614_s12 = smov %s1206_s15 }
 0x2e1   : > { %p11_p2 = scmp.ge.s32.totalorder %s14_s18, 26   ;;  %s1615_s13 = smov %s1210_s16 }
 0x2e2   : > { %s1616_s14 = smov %s1214_s17  ;;  %s1617_s15 = smov %s1621_s19 }
 0x2e3   : > { %s1618_s16 = smov %s1625_s20  ;;  %s1619_s17 = smov %s1629_s21 }
 0x2e4   :  { %13 = sbr.rel (!%p11_p2) target bundleno = 4 (0x4), region = 104 }

</bundles_post_ra>
